<compile_context>
chip_gen: v5e
topology: v5e:2x2
jax: 0.10.0
libtpu: 0.0.40
codegen_flags: <defaults>
</compile_context>

<pallas_src>
import functools

import jax
import jax.numpy as jnp
from jax.experimental import pallas as pl
from jax.experimental.pallas import tpu as pltpu


def _pick_tile_rows(nx, ny, nb, target_n=4096):
    """Pick output rows per grid step.

    Constraints: tile_rows divides nx, and tile_rows*ny is a multiple of 128
    (lane-dense flat output block) unless tile_rows == nx (full-dim block is
    always legal). Prefer the largest tile with tile_rows*ny <= target_n, and
    keep >= 2 total grid steps when possible (v7x has 2 TensorCores).
    """
    cands = sorted({d for d in range(1, nx + 1)
                    if nx % d == 0 and (d * ny) % 128 == 0} | {nx})
    under = [d for d in cands if d * ny <= target_n]
    tile_rows = max(under) if under else min(cands)
    if nb * (nx // tile_rows) < 2:          # keep both v7x TCs busy if we can
        smaller = [d for d in cands if d < tile_rows]
        if smaller:
            tile_rows = max(smaller)
    return tile_rows


def _gin_conv_kernel(w_ref, shift_ref, x_ref, o_ref, *, k, tile_rows, ny,
                     use_act):
    """One grid step = (one batch group b, one tile of output rows t).

    w_ref     : (1, k*k, out_ch, nc)  per-tap weights, compute dtype
    shift_ref : (1, out_ch, 1)        f32 bias
    x_ref     : (1, nc, nx+2p, ny+2p) full padded image of group b (VMEM resident)
    o_ref     : (1, out_ch, tile_rows*ny)  flat NCHW output slab (lane-dense)
    """
    nc = x_ref.shape[1]
    out_ch = o_ref.shape[1]
    tile_n = tile_rows * ny

    t = pl.program_id(1)
    r0 = t * tile_rows                       # first output row of this tile
    if tile_rows % 8 == 0:
        r0 = pl.multiple_of(r0, 8)

    acc = jnp.zeros((out_ch, tile_n), jnp.float32)
    # Fused im2col: build each (ci,dy,dx) tap directly from the VMEM block.
    for dy in range(k):
        for dx in range(k):
            tap = x_ref[0, :, pl.ds(r0 + dy, tile_rows), pl.ds(dx, ny)]
            acc = acc + jnp.dot(w_ref[0, dy * k + dx],
                                tap.reshape(nc, tile_n),
                                preferred_element_type=jnp.float32)
    acc = acc + shift_ref[0]                 # f32 bias on the VPU (free slack)
    if use_act:
        acc = jnp.where(acc >= 0, acc, 0.01 * acc)   # leaky_relu(0.01)
    o_ref[0] = acc.astype(o_ref.dtype)


def gin_block_forward(x, ker, shift, k, use_act=True,
                      compute_dtype=jnp.bfloat16, out_dtype=None,
                      target_tile_n=4096):
    """Pallas implementation of GradlessGCReplayNonlinBlock.forward (2D).

    Args:
      x     : [nb, nc, nx, ny]  (NCHW, like PyTorch); nc must equal in_channel
      ker   : [out_ch * nb, nc, k, k]
      shift : [out_ch * nb, 1, 1]
      k     : python int kernel size (from scale_pool, odd)
      compute_dtype : matmul operand dtype (bf16 for v6e/v7x MXU rate; f32 ok)
      out_dtype     : output dtype (default x.dtype; bf16 halves output bytes)
    Returns:
      [nb, out_ch, nx, ny]
    """
    nb, nc, nx, ny = x.shape
    out_ch = ker.shape[0] // nb
    p = k // 2
    N = nx * ny
    out_dtype = x.dtype if out_dtype is None else out_dtype

    # --- wrapper-side prep (plain JAX, no im2col materialization) ---
    xp = jnp.pad(x, ((0, 0), (0, 0), (p, p), (p, p))) if p > 0 else x
    nxp, nyp = nx + 2 * p, ny + 2 * p
    xp = xp.astype(compute_dtype)

    # per-tap weight layout: w_taps[b, dy*k+dx, co, ci] = ker[b*out_ch+co, ci, dy, dx]
    w_taps = (ker.reshape(nb, out_ch, nc, k, k)
                 .transpose(0, 3, 4, 1, 2)
                 .reshape(nb, k * k, out_ch, nc)
                 .astype(compute_dtype))
    shift_b = shift.reshape(nb, out_ch, 1).astype(jnp.float32)

    tile_rows = _pick_tile_rows(nx, ny, nb, target_tile_n)
    n_tiles = nx // tile_rows
    tile_n = tile_rows * ny                  # n_tiles * tile_n == N exactly

    kernel = functools.partial(_gin_conv_kernel, k=k, tile_rows=tile_rows,
                               ny=ny, use_act=use_act)

    cost = pl.CostEstimate(
        flops=2 * nb * out_ch * nc * k * k * N,
        transcendentals=0,
        bytes_accessed=(xp.size * xp.dtype.itemsize
                        + w_taps.size * w_taps.dtype.itemsize
                        + shift_b.size * 4
                        + nb * out_ch * N * jnp.dtype(out_dtype).itemsize))

    out = pl.pallas_call(
        kernel,
        out_shape=jax.ShapeDtypeStruct((nb, out_ch, N), out_dtype),
        grid=(nb, n_tiles),                  # spatial innermost: W / shift / image
        in_specs=[                           # blocks are fetched once per group
            pl.BlockSpec((1, k * k, out_ch, nc), lambda b, t: (b, 0, 0, 0)),
            pl.BlockSpec((1, out_ch, 1), lambda b, t: (b, 0, 0)),
            pl.BlockSpec((1, nc, nxp, nyp), lambda b, t: (b, 0, 0, 0)),
        ],
        out_specs=pl.BlockSpec((1, out_ch, tile_n), lambda b, t: (b, 0, t)),
        compiler_params=pltpu.CompilerParams(
            dimension_semantics=("parallel", "parallel")),
        cost_estimate=cost,
    )(w_taps, shift_b, xp)

    # n_tiles * tile_n == N -> metadata-only reshape (no slice, no HBM copy)
    return out.reshape(nb, out_ch, nx, ny)


def _reference_forward(x, ker, shift, k, use_act=True):
    """Pure-JAX reference mirroring the PyTorch grouped-conv forward."""
    nb, nc, nx, ny = x.shape
    out_ch = ker.shape[0] // nb
    x_r = x.reshape(1, nb * nc, nx, ny)
    out = jax.lax.conv_general_dilated(
        x_r, ker, window_strides=(1, 1),
        padding=[(k // 2, k // 2), (k // 2, k // 2)],
        dimension_numbers=("NCHW", "OIHW", "NCHW"),
        feature_group_count=nb)
    out = out + shift.reshape(1, nb * out_ch, 1, 1)
    if use_act:
        out = jnp.where(out >= 0, out, 0.01 * out)
    return out.reshape(nb, out_ch, nx, ny)


if __name__ == "__main__":
    # Module config (in_channel must equal nc for the grouped conv to be valid)
    nb, nc, nx, ny = 2, 4, 16, 16
    out_channel = 32
    scale_pool = [1, 3]

    key = jax.random.PRNGKey(0)
    k_key, x_key, key = jax.random.split(key, 3)

    # torch.randint(high=len(scale_pool), size=(1,)) equivalent (host-side draw,
    # mirrors the module); both possible k values are checked below.
    _drawn_k = scale_pool[int(jax.random.randint(k_key, (), 0, len(scale_pool)))]

    x = jax.random.normal(x_key, (nb, nc, nx, ny), dtype=jnp.float32)

    for k in scale_pool:                      # covers both outcomes of the draw
        ker_key, shift_key, key = jax.random.split(key, 3)
        ker = jax.random.normal(ker_key, (out_channel * nb, nc, k, k),
                                dtype=jnp.float32)
        shift = jax.random.normal(shift_key, (out_channel * nb, 1, 1),
                                  dtype=jnp.float32) * 1.0

        ref = jax.block_until_ready(_reference_forward(x, ker, shift, k))

        # f32 compute path: tight check vs the f32 reference.
        out_f32 = jax.block_until_ready(
            gin_block_forward(x, ker, shift, k, use_act=True,
                              compute_dtype=jnp.float32))
        assert out_f32.shape == (nb, out_channel, nx, ny), out_f32.shape
        assert jnp.allclose(out_f32, ref, atol=2e-4, rtol=2e-4), \
            (k, float(jnp.max(jnp.abs(out_f32 - ref))))

        # bf16 compute path (v6e/v7x perf path); shift stays f32 in-kernel.
        out_bf16 = jax.block_until_ready(
            gin_block_forward(x, ker, shift, k, use_act=True,
                              compute_dtype=jnp.bfloat16))
        assert out_bf16.shape == (nb, out_channel, nx, ny), out_bf16.shape
        assert jnp.allclose(out_bf16, ref, atol=2e-1, rtol=5e-2), \
            (k, float(jnp.max(jnp.abs(out_bf16 - ref))))

    print("KERNEL_OK")
</pallas_src>

<mosaic_0001>
module attributes {stable_mosaic.version = 11 : i64} {
  func.func @_gin_conv_kernel(%arg0: i32, %arg1: i32, %arg2: memref<1x1x32x4xf32, #tpu.memory_space<vmem>>, %arg3: memref<1x32x1xf32, #tpu.memory_space<vmem>>, %arg4: memref<1x4x16x16xf32, #tpu.memory_space<vmem>>, %arg5: memref<1x32x256xf32, #tpu.memory_space<vmem>>) attributes {dimension_semantics = [#tpu.dimension_semantics<parallel>, #tpu.dimension_semantics<parallel>], iteration_bounds = array<i64: 2, 1>, scalar_prefetch = 0 : i64, scratch_operands = 0 : i64, tpu.core_type = #tpu.core_type<tc>, window_params = [{transform_indices = @transform_0, window_bounds = array<i64: 1, 1, 32, 4>}, {transform_indices = @transform_1, window_bounds = array<i64: 1, 32, 1>}, {transform_indices = @transform_2, window_bounds = array<i64: 1, 4, 16, 16>}, {transform_indices = @transform_3, window_bounds = array<i64: 1, 32, 256>}]} {
    %c16_i32 = arith.constant 16 : i32
    %0 = arith.muli %arg1, %c16_i32 : i32
    %1 = tpu.assume_multiple %0, 8 : i32
    %cst = arith.constant 0.000000e+00 : f32
    %2 = vector.broadcast %cst : f32 to vector<32x256xf32>
    %c0_i32 = arith.constant 0 : i32
    %3 = arith.addi %1, %c0_i32 : i32
    %c0 = arith.constant 0 : index
    %c0_0 = arith.constant 0 : index
    %4 = arith.index_cast %3 : i32 to index
    %c0_1 = arith.constant 0 : index
    %5 = vector.load %arg4[%c0, %c0_0, %4, %c0_1] : memref<1x4x16x16xf32, #tpu.memory_space<vmem>>, vector<1x4x16x16xf32>
    %6 = vector.shape_cast %5 : vector<1x4x16x16xf32> to vector<4x16x16xf32>
    %c0_2 = arith.constant 0 : index
    %c0_3 = arith.constant 0 : index
    %c0_4 = arith.constant 0 : index
    %c0_5 = arith.constant 0 : index
    %7 = vector.load %arg2[%c0_2, %c0_3, %c0_4, %c0_5] : memref<1x1x32x4xf32, #tpu.memory_space<vmem>>, vector<1x1x32x4xf32>
    %8 = vector.shape_cast %7 : vector<1x1x32x4xf32> to vector<32x4xf32>
    %9 = vector.shape_cast %6 : vector<4x16x16xf32> to vector<4x256xf32>
    %cst_6 = arith.constant dense<0.000000e+00> : vector<32x256xf32>
    %10 = tpu.matmul %8, %9, %cst_6 {dimension_numbers = #tpu.dot_dimension_numbers<[1], [0], [0], [1], [0, 0, 1, 1], [], []>} : vector<32x4xf32>, vector<4x256xf32>, vector<32x256xf32> -> vector<32x256xf32>
    %11 = arith.addf %2, %10 : vector<32x256xf32>
    %c0_7 = arith.constant 0 : index
    %c0_8 = arith.constant 0 : index
    %c0_9 = arith.constant 0 : index
    %12 = vector.load %arg3[%c0_7, %c0_8, %c0_9] : memref<1x32x1xf32, #tpu.memory_space<vmem>>, vector<1x32x1xf32>
    %13 = vector.shape_cast %12 : vector<1x32x1xf32> to vector<32x1xf32>
    %14 = vector.broadcast %13 : vector<32x1xf32> to vector<32x256xf32>
    %15 = arith.addf %11, %14 : vector<32x256xf32>
    %cst_10 = arith.constant 0.000000e+00 : f32
    %16 = vector.broadcast %cst_10 : f32 to vector<32x256xf32>
    %17 = arith.cmpf oge, %15, %16 : vector<32x256xf32>
    %cst_11 = arith.constant 0.00999999977 : f32
    %18 = vector.broadcast %cst_11 : f32 to vector<32x256xf32>
    %19 = arith.mulf %18, %15 : vector<32x256xf32>
    %20 = arith.select %17, %15, %19 : vector<32x256xi1>, vector<32x256xf32>
    %c0_12 = arith.constant 0 : index
    %c0_13 = arith.constant 0 : index
    %c0_14 = arith.constant 0 : index
    %21 = vector.load %arg5[%c0_12, %c0_13, %c0_14] : memref<1x32x256xf32, #tpu.memory_space<vmem>>, vector<1x32x256xf32>
    %22 = vector.shape_cast %21 : vector<1x32x256xf32> to vector<32x256xf32>
    %23 = vector.shape_cast %20 : vector<32x256xf32> to vector<1x32x256xf32>
    tpu.vector_store %arg5[%c0_12, %c0_13, %c0_14], %23 {strides = array<i32>} : memref<1x32x256xf32, #tpu.memory_space<vmem>>, vector<1x32x256xf32>,
    return
  }
  func.func @transform_0(%arg0: i32, %arg1: i32) -> (i32, i32, i32, i32) {
    %c0_i32 = arith.constant 0 : i32
    %c0_i32_0 = arith.constant 0 : i32
    %c0_i32_1 = arith.constant 0 : i32
    %c0_i32_2 = arith.constant 0 : i32
    return %arg0, %c0_i32, %c0_i32_0, %c0_i32_1 : i32, i32, i32, i32
  }
  func.func @transform_1(%arg0: i32, %arg1: i32) -> (i32, i32, i32) {
    %c0_i32 = arith.constant 0 : i32
    %c0_i32_0 = arith.constant 0 : i32
    %c0_i32_1 = arith.constant 0 : i32
    return %arg0, %c0_i32, %c0_i32_0 : i32, i32, i32
  }
  func.func @transform_2(%arg0: i32, %arg1: i32) -> (i32, i32, i32, i32) {
    %c0_i32 = arith.constant 0 : i32
    %c0_i32_0 = arith.constant 0 : i32
    %c0_i32_1 = arith.constant 0 : i32
    %c0_i32_2 = arith.constant 0 : i32
    return %arg0, %c0_i32, %c0_i32_0, %c0_i32_1 : i32, i32, i32, i32
  }
  func.func @transform_3(%arg0: i32, %arg1: i32) -> (i32, i32, i32) {
    %c0_i32 = arith.constant 0 : i32
    %c0_i32_0 = arith.constant 0 : i32
    return %arg0, %c0_i32, %arg1 : i32, i32, i32
  }
}

</mosaic_0001>

<bundles_post_ra>
// kernel: tpu_custom_call.1
= control target key start
LH: loop header
LB: loop body
LE: loop exit
PB: predicated region body
PF: predicated region fallthrough
CT: control target
= control target key end

     0   :  { %8 = vsyncpa [#allocation3], 0  ;;  %s1059_s0 = inlined_call_operand.vmem [shape: f32[2,1,32,4], index: 0, kind: input, shape index: {}]   ;;  %s1060_s1 = inlined_call_operand.vmem [shape: f32[2,32,1], index: 1, kind: input, shape index: {}]   ;;  %s1061_s2 = inlined_call_operand.vmem [shape: f32[2,4,16,16], index: 2, kind: input, shape index: {}]   ;;  %s1062_s3 = inlined_call_operand.hbm [shape: f32[2,32,256], index: 3, kind: output, shape index: {}]  }
   0x1   :  { %10 = vsyncpa [#allocation3 + $0x1], 0  ;;  %s892_s12 = smov 0   ;;  %s894_s13 = smov 0  }
   0x2   :  { %s896_s14 = smov 0   ;;  %s898_s15 = smov 0  }
   0x3   :  { %s900_s16 = smov 0   ;;  %s902_s17 = smov 0  }
   0x4 LB: > { %s679_s18 = sadd.s32 4294967295, %s859_s17   ;;  %s680_s19 = sadd.s32 4294967294, %s859_s17   ;;  %s859_s17 = sphi %s902_s17, %s16_s17   ;;  %s855_s16 = sphi %s900_s16, %s1069_s16   ;;  %s851_s15 = sphi %s898_s15, %s1068_s15   ;;  %s847_s14 = sphi %s896_s14, %s1067_s14   ;;  %s843_s13 = sphi %s894_s13, %s1066_s13   ;;  %s839_s12 = sphi %s892_s12, %s1065_s12  }
   0x5   : > { %s28_s20 = sadd.s32 1, %s855_s16  ;;  %s115_s21 = sadd.s32 1, %s847_s14 }
   0x6   : > { %p30_p0 = scmp.ge.s32.totalorder %s28_s20, 2  ;;  %p125_p1 = scmp.ne.s32.totalorder %s847_s14, %s843_s13 }
   0x7   : > { %p126_p2 = scmp.eq.s32.totalorder %s679_s18, 1  ;;  %p131_p3 = scmp.ne.s32.totalorder %s843_s13, %s839_s12 }
   0x8   : > { %s1071_s20 = smov (%p30_p0, %s28_s20), 0  ;;  %p132_p5 = scmp.eq.s32.totalorder %s680_s19, 1 }
   0x9   : > { %p932_p4 = por %p126_p2, %p125_p1  ;;  %s110_s23 = ssub.s32 %s855_s16, %s1071_s20 }
   0xa   : > { %p683_p6 = scmp.ge.s32.totalorder %s859_s17, 1  ;;  %p113_p7 = scmp.eq.s32.totalorder %s110_s23, 0 }
   0xb   : > { %p939_p8 = por %p132_p5, %p131_p3  ;;  %p174_p9 = scmp.lt.s32.totalorder %s859_s17, 3 }
   0xc   : > { %s945_s25 = scalar_select %p113_p7, %s847_s14, %s115_s21  }
   0xd   : > { %p175_p10 = pnand %p683_p6, %p174_p9 }
   0xe   : > { %p208_p11 = scmp.lt.s32.totalorder (!%p175_p10), %s851_s15, 1  ;;  %s863_s4 = smov (!%p175_p10), 64  }
   0xf   : > { %178 = sbr.rel (%p175_p10) target bundleno = 335 (0x14f), region = 32  ;;  %s864_s5 = smov (!%p175_p10), 32  }
  0x10   : > { %s865_s6 = smov (!%p175_p10), 48   ;;  %s866_s7 = smov (!%p175_p10), 16  }
  0x11   : > { %s867_s8 = smov (!%p175_p10), 80   ;;  %s868_s9 = smov (!%p175_p10), 96  }
  0x12   : > { %s869_s10 = smov (!%p175_p10), 112   ;;  %s801_s23 = scalar_lea.hbm (!%p175_p10), %s1062_s3, 128 }
  0x14   : > { %s949_s26 = scalar_select %p208_p11, %s851_s15, 1  ;;  %v861_v0 = vmov 1983009808   ;;  %v862_v2 = vmov 1934713408   ;;  %vm239_vm0 = vcmask 1047556  }
  0x15   : > { %v244_v1 = vunpack.c.l.s4 %v861_v0  ;;  %v268_v3 = vunpack.c.l.s4 %v862_v2  ;;  %vm407_vm1 = vcmask 130048   ;;  %vm409_vm2 = vcmask 261120  }
  0x16   : > { %s708_s27 = sshll.u32 %s949_s26, 6  ;;  %s706_s11 = sshll.u32 %s949_s26, 5  ;;  %vm411_vm3 = vcmask 392192   ;;  %vm413_vm4 = vcmask 523264   ;;  %vm415_vm5 = vcmask 654336   ;;  %vm417_vm6 = vcmask 785408  }
  0x17   : > { %s222_s30 = scalar_lea.vmem %s1061_s2, %s708_s27  ;;  %v245_v7 = vunpack.c.0.s8 %v244_v1  ;;  %v955_v12 = vunpack.c.0.s8 %v268_v3  ;;  %s217_s21 = scalar_lea.vmem %s1060_s1, %s706_s11  ;;  %vm419_vm7 = vcmask 916480   ;;  %vm465_vm8 = vcmask 1043456  }
  0x18   : > { %v226_v4 = vld [vmem:[%s222_s30] sm:$0xff]  ;;  %v228_v5 = vld [vmem:[%s222_s30 + $0x10] sm:$0xff]  ;;  %v227_v14 = vld [vmem:[%s222_s30 + $0x8] sm:$0xff]  ;;  %s212_s28 = scalar_lea.vmem %s1059_s0, %s706_s11  ;;  %vm452_vm9 = vcmask 31744   ;;  %s205_s26 = sand.u32 1, %s843_s13  }
  0x19   : > { %v230_v6 = vld [vmem:[%s222_s30 + $0x20] sm:$0xff]  ;;  %v232_v8 = vld [vmem:[%s222_s30 + $0x30] sm:$0xff]  ;;  %v241_v10 = vrot.slane %v226_v4, 4  ;;  %v253_v11 = vrot.slane %v228_v5, 4  ;;  %v231_v15 = vld [vmem:[%s222_s30 + $0x28] sm:$0xff]  ;;  %v297_v35 = vrot.slane %v227_v14, 4 }
  0x1a   : > { %v238_v9 = vrot.slane %v230_v6, 4  ;;  %v251_v13 = vrot.slane %v232_v8, 4  ;;  %v233_v16 = vld [vmem:[%s222_s30 + $0x38] sm:$0xff]  ;;  %v295_v20 = vrot.slane %v231_v15, 4  ;;  %s684_s29 = sshll.u32 %s205_s26, 6 }
  0x1b   : > { %v242_v17 = vsel %vm239_vm0, %v230_v6, %v241_v10  ;;  %v254_v18 = vsel %vm239_vm0, %v232_v8, %v253_v11  ;;  %v229_v25 = vld [vmem:[%s222_s30 + $0x18] sm:$0xff]  ;;  %v307_v28 = vrot.slane %v233_v16, 4  ;;  %v298_v51 = vsel %vm239_vm0, %v231_v15, %v297_v35  ;;  %s1009_s30 = scalar_lea.vmem [#allocation2], %s684_s29 }
  0x1c   : > { %v240_v19 = vsel %vm239_vm0, %v238_v9, %v226_v4  ;;  %v250_v21 = vperm.slane %v242_v17, %v245_v7  ;;  %v262_v22 = vperm.slane %v254_v18, %v245_v7  ;;  %v252_v24 = vsel %vm239_vm0, %v251_v13, %v228_v5 }
  0x1d   : > { %v246_v23 = vperm.slane %v240_v19, %v245_v7  ;;  %v258_v26 = vperm.slane %v252_v24, %v245_v7  ;;  %v296_v27 = vsel %vm239_vm0, %v295_v20, %v227_v14  ;;  %v309_v29 = vrot.slane %v229_v25, 4  ;;  %v430_v20 = vld [vmem:[%s217_s21 + $0x10] sm:$0xff] }
  0x1e   : > { %v275_v30 = vrot.slane %v262_v22, 4  ;;  %v302_v32 = vperm.slane %v296_v27, %v245_v7  ;;  %v308_v34 = vsel %vm239_vm0, %v307_v28, %v229_v25  ;;  %v306_v56 = vperm.slane %v298_v51, %v245_v7 }
  0x1f   : > { %v265_v31 = vrot.slane %v246_v23, 4  ;;  %v263_v33 = vrot.slane %v258_v26, 4  ;;  %v314_v38 = vperm.slane %v308_v34, %v245_v7  ;;  %v310_v43 = vsel %vm239_vm0, %v233_v16, %v309_v29 }
  0x20   : > { %v276_v36 = vsel %vm239_vm0, %v275_v30, %v250_v21  ;;  %v321_v39 = vrot.slane %v302_v32, 4  ;;  %v318_v49 = vperm.slane %v310_v43, %v245_v7  ;;  %v277_v0 = vrot.slane %v250_v21, 4  ;;  %v429_v21 = vld [vmem:[%s217_s21 + $0x8] sm:$0xff] }
  0x21   : > { %v266_v37 = vsel %vm239_vm0, %v258_v26, %v265_v31  ;;  %v282_v40 = vperm.slane %v276_v36, %v955_v12  ;;  %v264_v42 = vsel %vm239_vm0, %v263_v33, %v246_v23  ;;  %v319_v46 = vrot.slane %v314_v38, 4  ;;  %v428_v23 = vld [vmem:[%s217_s21] sm:$0xff]  ;;  %v431_v31 = vld [vmem:[%s217_s21 + $0x18] sm:$0xff] }
  0x22   : > { %v274_v41 = vperm.slane %v266_v37, %v955_v12  ;;  %v322_v44 = vsel %vm239_vm0, %v314_v38, %v321_v39  ;;  %v971_v45 = vperm.slane %v264_v42, %v955_v12  ;;  %v331_v57 = vrot.slane %v318_v49, 4 }
  0x23   : > { %364 = vrot.lane.b32.xlu0 %v282_v40, %s863_s4  ;;  %v330_v50 = vperm.slane %v322_v44, %v955_v12  ;;  %v320_v52 = vsel %vm239_vm0, %v319_v46, %v302_v32  ;;  %v291_v62 = vrot.slane %v282_v40, 4  ;;  %v333_v2 = vrot.slane %v306_v56, 4 }
  0x24   : > { %356 = vrot.lane.b32.xlu1 %v274_v41, %s864_s5  ;;  %v289_v47 = vrot.slane %v274_v41, 4  ;;  %v287_v48 = vrot.slane %v971_v45, 4  ;;  %v326_v58 = vperm.slane %v320_v52, %v955_v12  ;;  %v332_v60 = vsel %vm239_vm0, %v331_v57, %v306_v56 }
  0x25   : > { %v345_v54 = vrot.slane %v330_v50, 4  ;;  %v338_v63 = vperm.slane %v332_v60, %v955_v12  ;;  %v292_v3 = vsel %vm239_vm0, 0.0, %v291_v62  ;;  %v278_v4 = vsel %vm239_vm0, %v262_v22, %v277_v0 }
  0x26   : > { %v290_v53 = vsel %vm239_vm0, 0.0, %v289_v47  ;;  %v288_v55 = vsel %vm239_vm0, 0.0, %v287_v48  ;;  %v343_v61 = vrot.slane %v326_v58, 4  ;;  %v334_v6 = vsel %vm239_vm0, %v318_v49, %v333_v2  ;;  %v236_v47 = vld [vmem:[%s212_s28 + $0x10] sm:$0xff]  ;;  %v234_v48 = vld [vmem:[%s212_s28] sm:$0xff]  ;;  %v237_v49 = vld [vmem:[%s212_s28 + $0x18] sm:$0xff] }
  0x27   : > { %360 = vrot.lane.b32.xlu2 %v290_v53, %s865_s6  ;;  %v346_v59 = vsel %vm239_vm0, 0.0, %v345_v54  ;;  %v347_v5 = vrot.slane %v338_v63, 4  ;;  %v286_v7 = vperm.slane %v278_v4, %v955_v12  ;;  %v342_v9 = vperm.slane %v334_v6, %v955_v12 }
  0x28   : > { %v344_v1 = vsel %vm239_vm0, 0.0, %v343_v61  ;;  %v870_v22 = vmov 0  }
  0x29   : > { %v348_v8 = vsel %vm239_vm0, 0.0, %v347_v5  ;;  %v349_v10 = vrot.slane %v342_v9, 4  ;;  %v293_v11 = vrot.slane %v286_v7, 4  ;;  %780 = vset.pattern.permute.xlu1 %v870_v22  ;;  %779 = vset.pattern.permute.xlu0 %v870_v22 }
  0x2a   : > { %778 = vset.pattern.permute.xlu2 %v870_v22 }
  0x2b   : > { %352 = vrot.lane.b32.xlu0 %v288_v55, %s866_s7  ;;  %v350_v13 = vsel %vm239_vm0, 0.0, %v349_v10  ;;  %v294_v14 = vsel %vm239_vm0, 0.0, %v293_v11 }
  0x2c   : > { %384 = vrot.lane.b32.xlu1 %v330_v50, %s864_s5  ;;  %v235_v50 = vld [vmem:[%s212_s28 + $0x8] sm:$0xff] }
  0x2f   : > { %388 = vrot.lane.b32.xlu2 %v346_v59, %s865_s6 }
  0x33   : > { %380 = vrot.lane.b32.xlu0 %v344_v1, %s866_s7 }
  0x34   : > { %392 = vrot.lane.b32.xlu1 %v338_v63, %s863_s4  ;;  %s709_s4 = sshll.u32 %s851_s15, 6  ;;  %s577_s15 = sshll.u32 %s1009_s30, 4  ;;  %s578_s15 = int_to_ptr.vmem [resolvable:$true] %s577_s15 }
  0x37   : > { %368 = vrot.lane.b32.xlu2 %v292_v3, %s867_s8 }
  0x3b   : > { %396 = vrot.lane.b32.xlu0 %v348_v8, %s867_s8  ;;  %s576_s8 = scalar_lea.hbm %s1062_s3, %s709_s4 }
  0x3c   : > { %372 = vrot.lane.b32.xlu1 %v286_v7, %s868_s9 }
  0x3f   : > { %400 = vrot.lane.b32.xlu2 %v342_v9, %s868_s9  ;;  %s579_s9 = sshll.u32 %s576_s8, 4  ;;  %s580_s9 = int_to_ptr.hbm [resolvable:$true] %s579_s9 }
  0x40   : > { %s795_s11 = sshra.s32 %s580_s9, 4  ;;  %s796_s11 = int_to_ptr.hbm [resolvable:$true] %s795_s11 }
  0x41   : > { %s797_s18 = scalar_lea.hbm %s796_s11, 64  ;;  %p802_p1 = scmp.lt.s32.totalorder %s796_s11, %s1062_s3 }
  0x42   : > { %p798_p12 = scmp.ne.s32.totalorder %s796_s11, %s797_s18  ;;  %p803_p2 = scmp.lt.s32.totalorder %s801_s23, %s797_s18 }
  0x43   : > { %376 = vrot.lane.b32.xlu0 %v294_v14, %s869_s10 }
  0x44   : > { %404 = vrot.lane.b32.xlu1 %v350_v13, %s869_s10  ;;  %s563_s10 = scalar_lea.sflag [#allocation3], %s205_s26  ;;  %p799_p13 = pnand %p798_p12, %p932_p4 }
  0x45   : > { %p804_p3 = por %p803_p2, %p802_p1 }
  0x46   : > { %p800_p0 = pneg %p799_p13 }
  0x47   : > { %434 = vperm.xlu2 %778, %v428_v23  }
  0x48   : > { %p805_p5 = pnand %p804_p3, %p800_p0 }
  0x4b   : > { %439 = vperm.xlu0 %779, %v429_v21  }
  0x4c   : > { %444 = vperm.xlu1 %780, %v430_v20  }
  0x4f   : > { %449 = vperm.xlu2 %778, %v431_v31  }
  0x81   : > { %v361_v17 = vpop.permute.xlu2 %360 }
  0x89   : > { %v389_v19 = vpop.permute.xlu2 %388 }
  0x91   : > { %v369_v28 = vpop.permute.xlu2 %368 }
  0x95   : > { %v365_v15 = vpop.permute.xlu0 %364 }
  0x96   : > { %v357_v16 = vpop.permute.xlu1 %356 }
  0x99   : > { %v401_v39 = vpop.permute.xlu2 %400 }
  0x9d   : > { %v353_v12 = vpop.permute.xlu0 %352 }
  0x9e   : > { %v385_v18 = vpop.permute.xlu1 %384  ;;  %v408_v26 = vsel %vm407_vm1, %v971_v45, %v353_v12 }
  0x9f   : > { %v410_v29 = vsel %vm409_vm2, %v408_v26, %v357_v16 }
  0xa0   : > { %v412_v34 = vsel %vm411_vm3, %v410_v29, %v361_v17 }
  0xa1   : > { %v414_v36 = vsel %vm413_vm4, %v412_v34, %v365_v15  ;;  %v435_v51 = vpop.permute.xlu2 %434 }
  0xa2   : > { %v416_v40 = vsel %vm415_vm5, %v414_v36, %v369_v28 }
  0xa5   : > { %v381_v25 = vpop.permute.xlu0 %380 }
  0xa6   : > { %v393_v24 = vpop.permute.xlu1 %392  ;;  %v421_v27 = vsel %vm407_vm1, %v326_v58, %v381_v25 }
  0xa7   : > { %v422_v30 = vsel %vm409_vm2, %v421_v27, %v385_v18 }
  0xa8   : > { %v423_v35 = vsel %vm411_vm3, %v422_v30, %v389_v19 }
  0xa9   : > { %v424_v37 = vsel %vm413_vm4, %v423_v35, %v393_v24  ;;  %v450_v11 = vpop.permute.xlu2 %449 }
  0xad   : > { %v397_v33 = vpop.permute.xlu0 %396 }
  0xae   : > { %v373_v32 = vpop.permute.xlu1 %372  ;;  %v425_v38 = vsel %vm415_vm5, %v424_v37, %v397_v33 }
  0xaf   : > { %v418_v41 = vsel %vm417_vm6, %v416_v40, %v373_v32  ;;  %v426_v42 = vsel %vm417_vm6, %v425_v38, %v401_v39 }
  0xb5   : > { %v377_v44 = vpop.permute.xlu0 %376 }
  0xb6   : > { %v405_v43 = vpop.permute.xlu1 %404  ;;  %v420_v45 = vsel %vm419_vm7, %v418_v41, %v377_v44 }
  0xb7   : > { %v427_v46 = vsel %vm419_vm7, %v426_v42, %v405_v43  ;;  %691 = vmatpush.msk.msra.mxu0 %vm465_vm8, %v420_v45  ;;  %710 = vmatpush.msk.msra.mxu2 %vm465_vm8, %v420_v45 }
  0xb8   : > { %696 = vmatpush.msk.msra.mxu1 %vm465_vm8, %v427_v46  ;;  %711 = vmatpush.msk.msra.mxu3 %vm465_vm8, %v427_v46 }
  0xb9   : > { %694 = vmatmul.msk.f32.vlgmr.msra.gmra.mxu2 %vm452_vm9, %v236_v47  ;;  %699 = vmatmul.msk.f32.vlgmr.msra.gmra.mxu3 %vm452_vm9, %v236_v47 }
  0xba   : > { %692 = vmatmul.msk.f32.vlgmr.msra.gmra.mxu0 %vm452_vm9, %v234_v48  ;;  %697 = vmatmul.msk.f32.vlgmr.msra.gmra.mxu1 %vm452_vm9, %v234_v48 }
  0xbd   : > { %v440_v1 = vpop.permute.xlu0 %439 }
  0xbe   : > { %v445_v58 = vpop.permute.xlu1 %444 }
  0xc1   : > { %695 = vmatmul.msk.f32.gmra.mxu2 %vm452_vm9, %v237_v49  ;;  %700 = vmatmul.msk.f32.gmra.mxu3 %vm452_vm9, %v237_v49 }
  0xc2   : > { %693 = vmatmul.msk.f32.gmra.mxu0 %vm452_vm9, %v235_v50  ;;  %698 = vmatmul.msk.f32.gmra.mxu1 %vm452_vm9, %v235_v50 }
 0x137   : > { %v489_v52 = vpop.f32.mrf.mxu0  ;;  %v518_v53 = vpop.f32.mrf.mxu1 }
 0x138   : > { %v490_v54 = vadd.f32 %v489_v52, %v435_v51  ;;  %v519_v55 = vadd.f32 %v518_v53, %v435_v51 }
 0x13a   : > { %vm530_vm10 = vcmp.ge.f32.partialorder %v490_v54, 0.0  ;;  %v538_v56 = vmul.f32 0.01, %v490_v54  ;;  %vm531_vm11 = vcmp.ge.f32.partialorder %v519_v55, 0.0  ;;  %v539_v57 = vmul.f32 0.01, %v519_v55 }
 0x13c   : > { %v546_v59 = vsel %vm530_vm10, %v490_v54, %v538_v56  ;;  %v547_v60 = vsel %vm531_vm11, %v519_v55, %v539_v57  ;;  %v495_v61 = vpop.f32.mrf.mxu2  ;;  %v524_v62 = vpop.f32.mrf.mxu3 }
 0x13d   : > { %554 = vst [vmem:[%s1009_s30] sm:$0xff] %v546_v59  ;;  %v496_v63 = vadd.f32 %v495_v61, %v445_v58  ;;  %v525_v0 = vadd.f32 %v524_v62, %v445_v58 }
 0x13e   : > { %555 = vst [vmem:[%s1009_s30 + $0x8] sm:$0xff] %v547_v60 }
 0x13f   : > { %vm534_vm12 = vcmp.ge.f32.partialorder %v496_v63, 0.0  ;;  %v542_v2 = vmul.f32 0.01, %v496_v63  ;;  %vm535_vm13 = vcmp.ge.f32.partialorder %v525_v0, 0.0  ;;  %v543_v3 = vmul.f32 0.01, %v525_v0  ;;  %v492_v4 = vpop.f32.mrf.mxu0  ;;  %v521_v5 = vpop.f32.mrf.mxu1 }
 0x140   : > { %v493_v6 = vadd.f32 %v492_v4, %v440_v1  ;;  %v522_v7 = vadd.f32 %v521_v5, %v440_v1 }
 0x141   : > { %v550_v8 = vsel %vm534_vm12, %v496_v63, %v542_v2  ;;  %v551_v9 = vsel %vm535_vm13, %v525_v0, %v543_v3 }
 0x142   : > { %558 = vst [vmem:[%s1009_s30 + $0x20] sm:$0xff] %v550_v8  ;;  %vm532_vm14 = vcmp.ge.f32.partialorder %v493_v6, 0.0  ;;  %v540_v10 = vmul.f32 0.01, %v493_v6  ;;  %vm533_vm15 = vcmp.ge.f32.partialorder %v522_v7, 0.0 }
 0x143   : > { %559 = vst [vmem:[%s1009_s30 + $0x28] sm:$0xff] %v551_v9  ;;  %v541_v13 = vmul.f32 0.01, %v522_v7 }
 0x144   : > { %v548_v14 = vsel %vm532_vm14, %v493_v6, %v540_v10  ;;  %v498_v15 = vpop.f32.mrf.mxu2  ;;  %v527_v16 = vpop.f32.mrf.mxu3 }
 0x145   : > { %556 = vst [vmem:[%s1009_s30 + $0x10] sm:$0xff] %v548_v14  ;;  %v549_v17 = vsel %vm533_vm15, %v522_v7, %v541_v13  ;;  %v499_v18 = vadd.f32 %v498_v15, %v450_v11  ;;  %v528_v12 = vadd.f32 %v527_v16, %v450_v11 }
 0x146   : > { %557 = vst [vmem:[%s1009_s30 + $0x18] sm:$0xff] %v549_v17 }
 0x147   : > { %vm536_vm0 = vcmp.ge.f32.partialorder %v499_v18, 0.0  ;;  %v544_v19 = vmul.f32 0.01, %v499_v18  ;;  %vm537_vm1 = vcmp.ge.f32.partialorder %v528_v12, 0.0  ;;  %v545_v20 = vmul.f32 0.01, %v528_v12 }
 0x149   : > { %v552_v21 = vsel %vm536_vm0, %v499_v18, %v544_v19  ;;  %v553_v22 = vsel %vm537_vm1, %v528_v12, %v545_v20 }
 0x14a   : > { %560 = vst [vmem:[%s1009_s30 + $0x30] sm:$0xff] %v552_v21 }
 0x14b   : > { %561 = vst [vmem:[%s1009_s30 + $0x38] sm:$0xff] %v553_v22 }
 0x14c   : > { %808 = shalt.err (!%p805_p5)
}
 0x14d   : > { %s871_s26 = smov 256  }
 0x14e   : > { %712 = dma.vmem_to_hbm [thread:$0]  (%p932_p4), %s578_s15, 1024, %s580_s9, %s563_s10, %s871_s26, %s871_s26, %s866_s7  }
 0x14f PF: > { %p718_p6 = scmp.ge.s32.totalorder %s859_s17, 2  ;;  %s594_s29 = sand.u32 1, %s839_s12  }
 0x150   : > { %s595_s30 = scalar_lea.sflag [#allocation3], %s594_s29 }
 0x151   : > { %p715_p7 = pnand %p718_p6, %p939_p8 }
 0x153   : > { %p716_p9 = pneg %p715_p7 }
 0x155   : > { %834 = dma.done.wait (%p716_p9), %s595_s30, 1024  }
 0x156   : > { %836 = vsyncadd (%p716_p9), %s595_s30, 4294966272  ;;  %s16_s17 = sadd.s32 1, %s859_s17   ;;  %s1065_s12 = smov %s843_s13 }
 0x157   : > { %p13_p10 = scmp.ge.s32.totalorder %s16_s17, 4   ;;  %s1066_s13 = smov %s847_s14 }
 0x158   : > { %s1067_s14 = smov %s945_s25  ;;  %s1068_s15 = smov %s855_s16 }
 0x159   : > { %s1069_s16 = smov %s1071_s20  ;;  %15 = sbr.rel (!%p13_p10) target bundleno = 4 (0x4), region = 74 }
 0x15e   :  { %601 = vsyncpa [#allocation3], 1 }
 0x15f   :  { %603 = vsyncpa [#allocation3 + $0x1], 1 }

</bundles_post_ra>
